<compile_context>
chip_gen: v7x
topology: tpu7x:2x2x1
jax: 0.10.0
libtpu: 0.0.40
codegen_flags: <defaults>
</compile_context>

<pallas_src>
import numpy as np
import jax
import jax.numpy as jnp
from jax.experimental import pallas as pl
from jax.experimental.pallas import tpu as pltpu


def _tv_kernel(x_ref, out_ref):
    """One (batch, channel) plane per grid step.

    x_ref   : (1, 1, H, W) block of the input
    out_ref : (1, 1, 1, 2) packed partial sums: [h_tv_partial, w_tv_partial]
    """
    x = x_ref[0, 0]                       # (H, W) f32, single load

    dh = x[1:, :] - x[:-1, :]             # (H-1, W) vertical differences
    dw = x[:, 1:] - x[:, :-1]             # (H, W-1) horizontal differences

    h_tv = jnp.sum(dh * dh, keepdims=True)   # (1, 1)
    w_tv = jnp.sum(dw * dw, keepdims=True)   # (1, 1)

    out_ref[0, 0] = jnp.concatenate([h_tv, w_tv], axis=-1)  # (1, 2)


def tv_loss(x, tv_loss_weight=1.0):
    """Mirrors TVLoss.forward for NCHW input `x`."""
    N, C, H, W = x.shape
    x = x.astype(jnp.float32)

    partials = pl.pallas_call(
        _tv_kernel,
        out_shape=jax.ShapeDtypeStruct((N, C, 1, 2), jnp.float32),
        grid=(N, C),
        in_specs=[pl.BlockSpec((1, 1, H, W), lambda n, c: (n, c, 0, 0))],
        out_specs=pl.BlockSpec((1, 1, 1, 2), lambda n, c: (n, c, 0, 0)),
        compiler_params=pltpu.CompilerParams(
            dimension_semantics=("parallel", "parallel")),
    )(x)

    h_tv = jnp.sum(partials[..., 0])
    w_tv = jnp.sum(partials[..., 1])

    count_h = (H - 1) * W
    count_w = H * (W - 1)
    return tv_loss_weight * 2.0 * (h_tv / count_h + w_tv / count_w) / N


# ----------------------------- pure-JAX reference ----------------------------
def _ref_tv_loss(x, tv_loss_weight=1.0):
    N, C, H, W = x.shape
    x = x.astype(jnp.float32)
    count_h = (H - 1) * W
    count_w = H * (W - 1)
    h_tv = jnp.sum(jnp.square(x[:, :, 1:, :] - x[:, :, :-1, :]))
    w_tv = jnp.sum(jnp.square(x[:, :, :, 1:] - x[:, :, :, :-1]))
    return tv_loss_weight * 2.0 * (h_tv / count_h + w_tv / count_w) / N


if __name__ == "__main__":
    key = jax.random.PRNGKey(0)
    N, C, H, W = 2, 4, 16, 16
    x = jax.random.normal(key, (N, C, H, W), dtype=jnp.float32)

    loss = tv_loss(x, tv_loss_weight=1.0)
    jax.block_until_ready(loss)

    ref = _ref_tv_loss(x, tv_loss_weight=1.0)
    np.testing.assert_allclose(np.asarray(loss), np.asarray(ref),
                               rtol=1e-5, atol=1e-5)

    print("KERNEL_OK")
</pallas_src>

<mosaic_0001>
module attributes {stable_mosaic.version = 11 : i64} {
  func.func @_tv_kernel(%arg0: i32, %arg1: i32, %arg2: memref<1x1x16x16xf32, #tpu.memory_space<vmem>>, %arg3: memref<1x1x1x2xf32, #tpu.memory_space<vmem>>) attributes {dimension_semantics = [#tpu.dimension_semantics<parallel>, #tpu.dimension_semantics<parallel>], iteration_bounds = array<i64: 2, 4>, scalar_prefetch = 0 : i64, scratch_operands = 0 : i64, tpu.core_type = #tpu.core_type<tc>, window_params = [{transform_indices = @transform_0, window_bounds = array<i64: 1, 1, 16, 16>}, {transform_indices = @transform_1, window_bounds = array<i64: 1, 1, 1, 2>}]} {
    %c0 = arith.constant 0 : index
    %c0_0 = arith.constant 0 : index
    %c0_1 = arith.constant 0 : index
    %c0_2 = arith.constant 0 : index
    %0 = vector.load %arg2[%c0, %c0_0, %c0_1, %c0_2] : memref<1x1x16x16xf32, #tpu.memory_space<vmem>>, vector<1x1x16x16xf32>
    %1 = vector.shape_cast %0 : vector<1x1x16x16xf32> to vector<16x16xf32>
    %2 = vector.extract_strided_slice %1 {offsets = [1, 0], sizes = [15, 16], strides = [1, 1]} : vector<16x16xf32> to vector<15x16xf32>
    %3 = vector.extract_strided_slice %1 {offsets = [0, 0], sizes = [15, 16], strides = [1, 1]} : vector<16x16xf32> to vector<15x16xf32>
    %4 = arith.subf %2, %3 : vector<15x16xf32>
    %5 = vector.extract_strided_slice %1 {offsets = [0, 1], sizes = [16, 15], strides = [1, 1]} : vector<16x16xf32> to vector<16x15xf32>
    %6 = vector.extract_strided_slice %1 {offsets = [0, 0], sizes = [16, 15], strides = [1, 1]} : vector<16x16xf32> to vector<16x15xf32>
    %7 = arith.subf %5, %6 : vector<16x15xf32>
    %8 = arith.mulf %4, %4 : vector<15x16xf32>
    %9 = vector.shape_cast %8 : vector<15x16xf32> to vector<1x15x16xf32>
    %cst = arith.constant dense<0.000000e+00> : vector<1xf32>
    %10 = vector.multi_reduction <add>, %9, %cst [1, 2] : vector<1x15x16xf32> to vector<1xf32>
    %11 = vector.shape_cast %10 : vector<1xf32> to vector<1x1x1xf32>
    %12 = vector.extract %11[0, 0, 0] : f32 from vector<1x1x1xf32>
    %13 = vector.broadcast %12 : f32 to vector<1x1xf32>
    %14 = arith.mulf %7, %7 : vector<16x15xf32>
    %15 = vector.shape_cast %14 : vector<16x15xf32> to vector<1x16x15xf32>
    %cst_3 = arith.constant dense<0.000000e+00> : vector<1xf32>
    %16 = vector.multi_reduction <add>, %15, %cst_3 [1, 2] : vector<1x16x15xf32> to vector<1xf32>
    %17 = vector.shape_cast %16 : vector<1xf32> to vector<1x1x1xf32>
    %18 = vector.extract %17[0, 0, 0] : f32 from vector<1x1x1xf32>
    %19 = vector.broadcast %18 : f32 to vector<1x1xf32>
    %20 = tpu.concatenate %13, %19 in 1 : vector<1x1xf32>, vector<1x1xf32> -> vector<1x2xf32>
    %c0_4 = arith.constant 0 : index
    %c0_5 = arith.constant 0 : index
    %c0_6 = arith.constant 0 : index
    %c0_7 = arith.constant 0 : index
    %21 = vector.load %arg3[%c0_4, %c0_5, %c0_6, %c0_7] : memref<1x1x1x2xf32, #tpu.memory_space<vmem>>, vector<1x1x1x2xf32>
    %22 = vector.shape_cast %21 : vector<1x1x1x2xf32> to vector<1x2xf32>
    %23 = vector.shape_cast %20 : vector<1x2xf32> to vector<1x1x1x2xf32>
    tpu.vector_store %arg3[%c0_4, %c0_5, %c0_6, %c0_7], %23 {strides = array<i32>} : memref<1x1x1x2xf32, #tpu.memory_space<vmem>>, vector<1x1x1x2xf32>,
    return
  }
  func.func @transform_0(%arg0: i32, %arg1: i32) -> (i32, i32, i32, i32) {
    %c0_i32 = arith.constant 0 : i32
    %c0_i32_0 = arith.constant 0 : i32
    %c0_i32_1 = arith.constant 0 : i32
    return %arg0, %arg1, %c0_i32, %c0_i32_0 : i32, i32, i32, i32
  }
  func.func @transform_1(%arg0: i32, %arg1: i32) -> (i32, i32, i32, i32) {
    %c0_i32 = arith.constant 0 : i32
    %c0_i32_0 = arith.constant 0 : i32
    %c0_i32_1 = arith.constant 0 : i32
    return %arg0, %arg1, %c0_i32, %c0_i32_0 : i32, i32, i32, i32
  }
}

</mosaic_0001>

<bundles_post_ra>
// kernel: tpu_custom_call.1
= control target key start
LH: loop header
LB: loop body
LE: loop exit
PB: predicated region body
PF: predicated region fallthrough
CT: control target
= control target key end

     0   :  { %6 = vsyncpa [#allocation3], 0  ;;  %s679_s0 = inlined_call_operand.hbm [shape: f32[2,4,16,16], index: 0, kind: input, shape index: {}]   ;;  %s680_s1 = inlined_call_operand.vmem [shape: f32[2,4,1,2], index: 1, kind: output, shape index: {}]  }
   0x1   :  { %8 = vsyncpa [#allocation3 + $0x1], 0  ;;  %s526_s6 = smov 0   ;;  %s528_s7 = smov 0  }
   0x2   :  { %s530_s8 = smov 0   ;;  %s532_s9 = smov 0  }
   0x3   :  { %s534_s10 = smov 0   ;;  %s536_s11 = smov 0  }
   0x4   :  { %s538_s12 = smov 0   ;;  %s540_s13 = smov 0  }
   0x5 LB: > { %s321_s14 = sadd.s32 4294967295, %s509_s13   ;;  %s23_s15 = sadd.s32 1, %s501_s11  ;;  %s509_s13 = sphi %s540_s13, %s14_s13   ;;  %s505_s12 = sphi %s538_s12, %s691_s12   ;;  %s501_s11 = sphi %s536_s11, %s690_s11   ;;  %s497_s10 = sphi %s534_s10, %s689_s10   ;;  %s493_s9 = sphi %s532_s9, %s688_s9   ;;  %s489_s8 = sphi %s530_s8, %s687_s8   ;;  %s485_s7 = sphi %s528_s7, %s686_s7   ;;  %s481_s6 = sphi %s526_s6, %s685_s6  }
   0x6   : > { %p24_p0 = scmp.ge.s32.totalorder %s23_s15, 4  ;;  %s26_s16 = sadd.s32 1, %s505_s12 }
   0x7   : > { %s35_s17 = sadd.s32 1, %s489_s8  ;;  %p42_p1 = scmp.ne.s32.totalorder %s489_s8, %s485_s7 }
   0x8   : > { %s693_s15 = smov (%p24_p0, %s23_s15), 0  ;;  %s695_s16 = smov (!%p24_p0, %s26_s16), %s505_s12 }
   0x9   : > { %s31_s18 = ssub.s32 %s501_s11, %s693_s15  ;;  %p43_p2 = scmp.eq.s32.totalorder %s509_s13, 0 }
   0xa   : > { %p28_p3 = scmp.ge.s32.totalorder %s695_s16, 2  ;;  %p48_p4 = scmp.ne.s32.totalorder %s485_s7, %s481_s6 }
   0xb   : > { %p577_p5 = por %p43_p2, %p42_p1  ;;  %p49_p6 = scmp.eq.s32.totalorder %s321_s14, 0 }
   0xc   : > { %s697_s16 = smov (%p28_p3, %s695_s16), 0  ;;  %p344_p8 = scmp.lt.s32.totalorder %s509_s13, 8 }
   0xd   : > { %p583_p7 = por %p49_p6, %p48_p4  ;;  %s30_s21 = ssub.s32 %s505_s12, %s697_s16 }
   0xe   : > { %s32_s22 = sor.u32 %s31_s18, %s30_s21  ;;  %s100_s23 = sand.u32 1, %s489_s8  }
   0xf   : > { %p33_p9 = scmp.eq.s32.totalorder %s32_s22, 0  ;;  %s325_s24 = sshll.u32 %s100_s23, 4 }
  0x10   : > { %s326_s25 = sshll.u32 %s501_s11, 1  ;;  %s327_s27 = sshll.u32 %s505_s12, 3 }
  0x11   : > { %s593_s26 = scalar_select %p33_p9, %s489_s8, %s35_s17  }
  0x12   : > { %s110_s28 = sadd.s32 %s327_s27, %s326_s25  ;;  %s104_s29 = scalar_lea.vmem [#allocation2], %s325_s24 }
  0x13   : > { %s113_s30 = sshll.u32 %s104_s29, 4  ;;  %s328_s2 = sshll.u32 %s110_s28, 7  ;;  %s596_s30 = int_to_ptr.vmem [resolvable:$true] %s113_s30 }
  0x14   : > { %s601_s5 = scalar_lea.hbm %s679_s0, %s328_s2  ;;  %p607_p10 = pnand %p344_p8, %p577_p5 }
  0x15   : > { %s612_s14 = scalar_lea.sflag [#allocation3], %s100_s23  ;;  %s413_s17 = scalar_lea.hbm %s601_s5, 256 }
  0x16   : > { %p414_p12 = scmp.ne.s32.totalorder %s601_s5, %s413_s17  ;;  %p415_p13 = pneg %p607_p10 }
  0x17   : > { %s418_s21 = scalar_lea.hbm %s679_s0, 2048  ;;  %p419_p2 = scmp.lt.u32.totalorder %s601_s5, %s679_s0 }
  0x18   : > { %p416_p0 = pnand %p415_p13, %p414_p12  ;;  %p420_p3 = scmp.lt.u32.totalorder %s418_s21, %s413_s17 }
  0x19   : > { %p422_p5 = scmp.lt.u32.totalorder %s413_s17, %s601_s5 }
  0x1a   : > { %p417_p1 = pneg %p416_p0  ;;  %p421_p4 = por %p420_p3, %p419_p2 }
  0x1c   : > { %p423_p6 = por %p422_p5, %p421_p4 }
  0x1e   : > { %p424_p8 = pnand %p423_p6, %p417_p1 }
  0x20   : > { %427 = shalt.err (!%p424_p8)
}
  0x21   : > { %s428_s23 = scalar_lea.vmem %s596_s30, 256  ;;  %s511_s25 = smov [#allocation2]  }
  0x22   : > { %p429_p9 = scmp.ne.s32.totalorder %s596_s30, %s428_s23  ;;  %s433_s27 = sshll.u32 %s511_s25, 4  ;;  %s434_s27 = int_to_ptr.vmem [resolvable:$false] %s433_s27 }
  0x23   : > { %s435_s28 = scalar_lea.vmem %s434_s27, 512  ;;  %p436_p11 = scmp.lt.s32.totalorder %s596_s30, %s434_s27 }
  0x24   : > { %p431_p12 = pnand %p429_p9, %p415_p13  ;;  %p437_p2 = scmp.lt.s32.totalorder %s435_s28, %s428_s23 }
  0x26   : > { %p432_p0 = pneg %p431_p12  ;;  %p438_p3 = por %p437_p2, %p436_p11 }
  0x28   : > { %p439_p4 = pnand %p438_p3, %p432_p0 }
  0x2a   : > { %442 = shalt.err (!%p439_p4)
}
  0x2b   : > { %s512_s29 = smov 128   ;;  %s513_s2 = smov 8  }
  0x2c   : > { %343 = dma.hbm_to_vmem [thread:$0]  (!%p607_p10), %s601_s5, 256, %s596_s30, %s612_s14, %s512_s29, %s512_s29, %s513_s2  }
  0x2d   : > { %p121_p13 = scmp.lt.s32.totalorder %s509_s13, 9  ;;  %p684_p1 = scmp.ge.s32.totalorder %s509_s13, 1 }
  0x2f   : > { %p122_p5 = pnand %p684_p1, %p121_p13 }
  0x30   : > { %s127_s3 = sand.u32 (!%p122_p5), 1, %s485_s7  }
  0x31   : > { %125 = sbr.rel (%p122_p5) target bundleno = 506 (0x1fa), region = 24  ;;  %s330_s4 = sshll.u32 (!%p122_p5), %s127_s3, 4 }
  0x32   : > { %s128_s17 = scalar_lea.sflag (!%p122_p5), [#allocation3], %s127_s3  ;;  %s131_s18 = scalar_lea.vmem (!%p122_p5), [#allocation2], %s330_s4 }
  0x38   : > { %476 = dma.done.wait (%p583_p7), %s128_s17, 256  }
  0x39   : > { %478 = vsyncadd (%p583_p7), %s128_s17, 4294967040  ;;  %v159_v0 = vld [vmem:[%s131_s18] sm:$0xff]  ;;  %s514_s19 = smov 1   ;;  %v160_v1 = vld [vmem:[%s131_s18 + $0x8] sm:$0xff]  ;;  %vm163_vm0 = vcmask 1040384   ;;  %vm183_vm1 = vcmask 1046528  }
  0x3a   : > { %171 = vrot.lane.b32.xlu0 %v159_v0, %s514_s19  ;;  %v164_v2 = vrot.slane %v159_v0, 7  ;;  %v165_v3 = vrot.slane %v160_v1, 7  ;;  %vm189_vm2 = vcmask 130048   ;;  %vm191_vm3 = vcmask 129024   ;;  %s515_s20 = smov 127   ;;  %p152_p7 = scmp.lt.s32.totalorder %s497_s10, 1 }
  0x3b   : > { %vm214_vm4 = vcmask 121856   ;;  %p154_p10 = scmp.lt.s32.totalorder %s493_s9, 3  ;;  %vm228_vm5 = vcmask 7168   ;;  %vm230_vm6 = vcmask 8192  }
  0x3c   : > { %v169_v4 = vsub.f32 %v159_v0, %v164_v2  ;;  %v166_v5 = vsel %vm163_vm0, %v164_v2, %v165_v3  ;;  %s699_s10 = smov (!%p152_p7, %s497_s10), 1 }
  0x3d   : > { %v170_v7 = vsub.f32 %v160_v1, %v166_v5  ;;  %s701_s9 = smov (!%p154_p10, %s493_s9), 3  ;;  %s331_s30 = sshll.u32 %s699_s10, 2 }
  0x3e   : > { %173 = vrot.lane.b32.xlu0 %v160_v1, %s514_s19  ;;  %v179_v6 = vmul.f32 %v169_v4, %v169_v4  ;;  %s157_s5 = sadd.s32 %s331_s30, %s701_s9 }
  0x3f   : > { %v180_v8 = vmul.f32 %v170_v7, %v170_v7  ;;  %s158_s22 = scalar_lea.vmem %s680_s1, %s157_s5 }
  0x40   : > { %v184_v9 = vrot.slane %v179_v6, 1 }
  0x41   : > { %v185_v10 = vrot.slane %v180_v8, 1 }
  0x43   : > { %v186_v11 = vsel %vm183_vm1, %v184_v9, %v185_v10  ;;  %v192_v13 = vsel %vm191_vm3, %v185_v10, 0.0 }
  0x44   : > { %v190_v12 = vsel %vm189_vm2, %v186_v11, 0.0 }
  0x45   : > { %v193_v14 = vadd.f32 %v192_v13, %v190_v12 }
  0x5d   : > { %194 = vadd.xlane.f32.xlu0 %v193_v14 }
  0xac   : > { %v172_v15 = vpop.permute.xlu0 %171 }
  0xad   : > { %v177_v16 = vsub.f32 %v159_v0, %v172_v15 }
  0xaf   : > { %v204_v17 = vmul.f32 %v177_v16, %v177_v16 }
  0xb0   : > { %v174_v18 = vpop.permute.xlu0 %173 }
  0xb1   : > { %v178_v19 = vsub.f32 %v160_v1, %v174_v18  ;;  %208 = vrot.lane.b32.xlu1 %v204_v17, %s515_s20 }
  0xb3   : > { %v205_v20 = vmul.f32 %v178_v19, %v178_v19 }
  0xb5   : > { %210 = vrot.lane.b32.xlu1 %v205_v20, %s515_s20 }
  0xea   : > { %v195_v26 = vpop.xlane.xlu0 %194 }
  0xeb   : > { %v196_v27 = vrot.slane %v195_v26, 4 }
  0xed   : > { %v197_v28 = vadd.f32 %v196_v27, %v195_v26 }
  0xef   : > { %v198_v29 = vrot.slane %v197_v28, 2 }
  0xf1   : > { %v199_v30 = vadd.f32 %v198_v29, %v197_v28 }
  0xf3   : > { %v200_v31 = vrot.slane %v199_v30, 1 }
  0xf5   : > { %v201_v32 = vadd.f32 %v200_v31, %v199_v30 }
  0xf7   : > { %334 = vpush %v201_v32 }
 0x123   : > { %v209_v21 = vpop.permute.xlu1 %208 }
 0x124   : > { %v215_v23 = vsel %vm214_vm4, %v209_v21, 0.0 }
 0x127   : > { %v211_v22 = vpop.permute.xlu1 %210 }
 0x128   : > { %v216_v24 = vsel %vm214_vm4, %v211_v22, 0.0  ;;  %s335_s6 = spop %334 }
 0x129   : > { %v217_v25 = vadd.f32 %v216_v24, %v215_v23  ;;  %v203_v40 = vstv %s335_s6 }
 0x12b   : > { %218 = vadd.xlane.f32.xlu1 %v217_v25 }
 0x1b8   : > { %v219_v33 = vpop.xlane.xlu1 %218 }
 0x1b9   : > { %v220_v34 = vrot.slane %v219_v33, 4 }
 0x1bb   : > { %v221_v35 = vadd.f32 %v220_v34, %v219_v33 }
 0x1bd   : > { %v222_v36 = vrot.slane %v221_v35, 2 }
 0x1bf   : > { %v223_v37 = vadd.f32 %v222_v36, %v221_v35 }
 0x1c1   : > { %v224_v38 = vrot.slane %v223_v37, 1 }
 0x1c3   : > { %v225_v39 = vadd.f32 %v224_v38, %v223_v37 }
 0x1c5   : > { %336 = vpush %v225_v39 }
 0x1f6   : > { %s337_s24 = spop %336 }
 0x1f7   : > { %v227_v41 = vstv %s337_s24 }
 0x1f8   : > { %v229_v42 = vsel %vm228_vm5, %v203_v40, %v227_v41 }
 0x1f9   : > { %231 = vst.msk [vmem:[%s158_s22] sm:$0x1] %vm230_vm6, %v229_v42 }
 0x1fa PF: > { %s14_s13 = sadd.s32 1, %s509_s13   ;;  %s685_s6 = smov %s485_s7 }
 0x1fb   : > { %p11_p11 = scmp.ge.s32.totalorder %s14_s13, 10   ;;  %s686_s7 = smov %s489_s8 }
 0x1fc   : > { %s687_s8 = smov %s593_s26  ;;  %s688_s9 = smov %s501_s11 }
 0x1fd   : > { %s689_s10 = smov %s505_s12  ;;  %s690_s11 = smov %s693_s15 }
 0x1fe   : > { %s691_s12 = smov %s697_s16  ;;  %13 = sbr.rel (!%p11_p11) target bundleno = 5 (0x5), region = 64 }
 0x205   :  { %257 = vsyncpa [#allocation3], 1 }
 0x206   :  { %259 = vsyncpa [#allocation3 + $0x1], 1 }

</bundles_post_ra>
